<compile_context>
chip_gen: v6e
topology: v6e:2x2x1
jax: 0.10.0
libtpu: 0.0.40
codegen_flags: <defaults>
</compile_context>

<pallas_src>
import jax
import jax.numpy as jnp
import numpy as np
from jax import lax
from jax.experimental import pallas as pl
from jax.experimental.pallas import tpu as pltpu


def _make_kernel(BB, M, H):
    def kernel(q_ref, key_ref, wq_ref, bq_ref, wk_ref, bk_ref, o_ref):
        # q_ref  : (BB, 1, Sq*H)  flattened queries (lane-dense)
        # key_ref: (BB, M, Sk*H)  flattened RAW keys (lane-dense)
        # wq_ref : (Sq*H, H) = tile(W_q^T, Sq)     bq_ref: (1, H) = Sq * b_q
        # wk_ref : (Sk*H, H) = tile(W_k^T, Sk)     bk_ref: (1, H) = Sk * b_k
        # o_ref  : (BB, 1, Sk*H)
        Dq = q_ref.shape[-1]
        Dk = key_ref.shape[-1]
        k_raw = key_ref[...]                                        # (BB, M, Dk)

        # Two independent MXU matmuls, back-to-back (they pipeline in the MXU).
        qp = jnp.dot(q_ref[...].reshape(BB, Dq), wq_ref[...],
                     preferred_element_type=jnp.float32)            # (BB, H)
        kp = jnp.dot(k_raw.reshape(BB * M, Dk), wk_ref[...],
                     preferred_element_type=jnp.float32)            # (BB*M, H)

        qp3 = (qp + bq_ref[...]).reshape(BB, 1, H)                  # sum_q w_q(query)
        kp3 = (kp + bk_ref[...]).reshape(BB, M, H)                  # sum_s w_k(key[m])

        # attention[b, m] up to the positive constant 1/(Sk*sqrt(H))
        attn = jnp.sum(qp3 * kp3, axis=-1, keepdims=True)           # (BB, M, 1)

        # first-occurrence argmax over memory slots (torch.max tie behavior)
        amax = jnp.max(attn, axis=1, keepdims=True)                 # (BB, 1, 1)
        ridx = lax.broadcasted_iota(jnp.int32, (BB, M, 1), 1)       # (BB, M, 1)
        best = jnp.min(jnp.where(attn == amax, ridx, M),
                       axis=1, keepdims=True)                       # (BB, 1, 1)

        # bit-exact raw-key copy: VPU select + sublane sum (no MXU on the tail)
        picked = jnp.where(ridx == best, k_raw, jnp.zeros_like(k_raw))
        o_ref[...] = jnp.sum(picked, axis=1, keepdims=True).astype(o_ref.dtype)

    return kernel


def prepare_params(params, seq_q, seq_k):
    """One-time weight preprocessing (hoisted out of the per-call path).

    Tiling W^T along the contraction dim folds the sum over query/key positions
    into the projection matmul; biases are pre-scaled by the position count.
    """
    H = params["w_q"].shape[0]
    return {
        "wq_tiled": jnp.tile(params["w_q"].T, (seq_q, 1)),          # (Sq*H, H)
        "wk_tiled": jnp.tile(params["w_k"].T, (seq_k, 1)),          # (Sk*H, H)
        "bq_sum": (params["b_q"] * jnp.float32(seq_q)).reshape(1, H),
        "bk_sum": (params["b_k"] * jnp.float32(seq_k)).reshape(1, H),
    }


def _pick_batch_block(bsz, per_batch_block_bytes):
    """Batch elements per grid step.

    Per-step overhead is ~0.35 us while per-batch work is a few hundred MXU
    cycles, so small batches collapse to one step; larger batches keep >= 2
    steps (v7x megacore split of the 'parallel' axis) and blocks stay ~<=2 MiB.
    """
    cap = max(1, (2 << 20) // max(1, per_batch_block_bytes))
    if bsz <= min(8, cap):
        return bsz                                    # single grid step
    limit = max(1, min(cap, 128, max(1, bsz // 2)))   # leave >= 2 grid steps
    best = 1
    for d in range(1, limit + 1):
        if bsz % d == 0:
            best = d
    return best


def self_attention_select(query, key, prepped):
    """query: (bsz, Sq, H), key: (bsz*M, Sk, H); prepped = prepare_params(...)."""
    bsz, Sq, H = query.shape
    msz, Sk, Hk = key.shape
    assert Hk == H and msz % bsz == 0
    M = msz // bsz
    Dq, Dk = Sq * H, Sk * H

    BB = _pick_batch_block(bsz, M * Dk * key.dtype.itemsize)
    grid = (bsz // BB,)

    # Lane-dense, row-major flattenings (metadata-only reshapes).
    q_flat = query.reshape(bsz, 1, Dq)
    key_flat = key.reshape(bsz, M, Dk)       # matches key.view(bsz, M, Sk, H)

    out = pl.pallas_call(
        _make_kernel(BB, M, H),
        out_shape=jax.ShapeDtypeStruct((bsz, 1, Dk), key.dtype),
        grid_spec=pltpu.PrefetchScalarGridSpec(
            num_scalar_prefetch=0,
            grid=grid,
            in_specs=[
                pl.BlockSpec((BB, 1, Dq), lambda b: (b, 0, 0)),
                pl.BlockSpec((BB, M, Dk), lambda b: (b, 0, 0)),
                pl.BlockSpec((Dq, H), lambda b: (0, 0)),
                pl.BlockSpec((1, H), lambda b: (0, 0)),
                pl.BlockSpec((Dk, H), lambda b: (0, 0)),
                pl.BlockSpec((1, H), lambda b: (0, 0)),
            ],
            out_specs=pl.BlockSpec((BB, 1, Dk), lambda b: (b, 0, 0)),
        ),
        compiler_params=pltpu.CompilerParams(dimension_semantics=("parallel",)),
    )(q_flat, key_flat, prepped["wq_tiled"], prepped["bq_sum"],
      prepped["wk_tiled"], prepped["bk_sum"])
    return out.reshape(bsz, Sk, H)


def reference(query, key, params):
    """Pure-JAX transcription of the torch forward (mask=None path)."""
    bsz, Sq, H = query.shape
    msz, Sk, _ = key.shape
    M = msz // bsz
    Q = query @ params["w_q"].T + params["b_q"]                       # (bsz, Sq, H)
    K = (key @ params["w_k"].T + params["b_k"]).reshape(bsz, M, Sk, H)
    key4 = key.reshape(bsz, M, Sk, H)
    energy = jnp.einsum("bqh,bmsh->bmqs", Q, K) / jnp.sqrt(jnp.float32(H))
    total_attention = jnp.sum(energy, axis=-2)                        # (bsz, M, Sk)
    attention = jnp.mean(total_attention, axis=-1)                    # (bsz, M)
    max_index = jnp.argmax(attention, axis=-1)                        # (bsz,)
    return key4[jnp.arange(bsz), max_index]                           # (bsz, Sk, H)


if __name__ == "__main__":
    hid_dim, n_heads, dropout = 32, 4, 0.1
    bsz, Sq, M, Sk = 2, 8, 3, 8
    msz = bsz * M

    root = jax.random.PRNGKey(0)
    kq, kk, kwq, kbq, kwk, kbk = jax.random.split(root, 6)
    bound = 1.0 / float(np.sqrt(hid_dim))          # nn.Linear default init bound
    params = {
        "w_q": jax.random.uniform(kwq, (hid_dim, hid_dim), jnp.float32, -bound, bound),
        "b_q": jax.random.uniform(kbq, (hid_dim,), jnp.float32, -bound, bound),
        "w_k": jax.random.uniform(kwk, (hid_dim, hid_dim), jnp.float32, -bound, bound),
        "b_k": jax.random.uniform(kbk, (hid_dim,), jnp.float32, -bound, bound),
    }
    query = jax.random.normal(kq, (bsz, Sq, hid_dim), jnp.float32)
    key = jax.random.normal(kk, (msz, Sk, hid_dim), jnp.float32)

    # One-time parameter preprocessing (hoisted out of the per-call path).
    prepped = jax.tree_util.tree_map(jax.block_until_ready, prepare_params(params, Sq, Sk))

    attn_fn = jax.jit(self_attention_select)
    out = jax.block_until_ready(attn_fn(query, key, prepped))

    ref = reference(query, key, params)
    np.testing.assert_allclose(np.asarray(out), np.asarray(ref), rtol=1e-4, atol=1e-4)
    print("KERNEL_OK")
</pallas_src>

<mosaic_0001>
module attributes {stable_mosaic.version = 11 : i64} {
  func.func @kernel(%arg0: i32, %arg1: memref<2x1x256xf32, #tpu.memory_space<vmem>>, %arg2: memref<2x3x256xf32, #tpu.memory_space<vmem>>, %arg3: memref<256x32xf32, #tpu.memory_space<vmem>>, %arg4: memref<1x32xf32, #tpu.memory_space<vmem>>, %arg5: memref<256x32xf32, #tpu.memory_space<vmem>>, %arg6: memref<1x32xf32, #tpu.memory_space<vmem>>, %arg7: memref<2x1x256xf32, #tpu.memory_space<vmem>>) attributes {dimension_semantics = [#tpu.dimension_semantics<parallel>], iteration_bounds = array<i64: 1>, scalar_prefetch = 0 : i64, scratch_operands = 0 : i64, tpu.core_type = #tpu.core_type<tc>, window_params = [{transform_indices = @transform_0, window_bounds = array<i64: 2, 1, 256>}, {transform_indices = @transform_1, window_bounds = array<i64: 2, 3, 256>}, {pipeline_mode = #tpu.pipeline_mode<synchronous>, transform_indices = @transform_2, window_bounds = array<i64: 256, 32>}, {pipeline_mode = #tpu.pipeline_mode<synchronous>, transform_indices = @transform_3, window_bounds = array<i64: 1, 32>}, {pipeline_mode = #tpu.pipeline_mode<synchronous>, transform_indices = @transform_4, window_bounds = array<i64: 256, 32>}, {pipeline_mode = #tpu.pipeline_mode<synchronous>, transform_indices = @transform_5, window_bounds = array<i64: 1, 32>}, {transform_indices = @transform_6, window_bounds = array<i64: 2, 1, 256>}]} {
    %c0 = arith.constant 0 : index
    %c0_0 = arith.constant 0 : index
    %c0_1 = arith.constant 0 : index
    %0 = vector.load %arg2[%c0, %c0_0, %c0_1] : memref<2x3x256xf32, #tpu.memory_space<vmem>>, vector<2x3x256xf32>
    %c0_2 = arith.constant 0 : index
    %c0_3 = arith.constant 0 : index
    %c0_4 = arith.constant 0 : index
    %1 = vector.load %arg1[%c0_2, %c0_3, %c0_4] : memref<2x1x256xf32, #tpu.memory_space<vmem>>, vector<2x1x256xf32>
    %2 = vector.shape_cast %1 : vector<2x1x256xf32> to vector<2x256xf32>
    %c0_5 = arith.constant 0 : index
    %c0_6 = arith.constant 0 : index
    %3 = vector.load %arg3[%c0_5, %c0_6] : memref<256x32xf32, #tpu.memory_space<vmem>>, vector<256x32xf32>
    %cst = arith.constant dense<0.000000e+00> : vector<2x32xf32>
    %4 = tpu.matmul %2, %3, %cst {dimension_numbers = #tpu.dot_dimension_numbers<[1], [0], [0], [1], [0, 0, 1, 1], [], []>} : vector<2x256xf32>, vector<256x32xf32>, vector<2x32xf32> -> vector<2x32xf32>
    %5 = vector.shape_cast %0 : vector<2x3x256xf32> to vector<6x256xf32>
    %c0_7 = arith.constant 0 : index
    %c0_8 = arith.constant 0 : index
    %6 = vector.load %arg5[%c0_7, %c0_8] : memref<256x32xf32, #tpu.memory_space<vmem>>, vector<256x32xf32>
    %cst_9 = arith.constant dense<0.000000e+00> : vector<6x32xf32>
    %7 = tpu.matmul %5, %6, %cst_9 {dimension_numbers = #tpu.dot_dimension_numbers<[1], [0], [0], [1], [0, 0, 1, 1], [], []>} : vector<6x256xf32>, vector<256x32xf32>, vector<6x32xf32> -> vector<6x32xf32>
    %c0_10 = arith.constant 0 : index
    %c0_11 = arith.constant 0 : index
    %8 = vector.load %arg4[%c0_10, %c0_11] : memref<1x32xf32, #tpu.memory_space<vmem>>, vector<1x32xf32>
    %9 = vector.broadcast %8 : vector<1x32xf32> to vector<2x32xf32>
    %10 = arith.addf %4, %9 : vector<2x32xf32>
    %11 = vector.shape_cast %10 : vector<2x32xf32> to vector<2x1x32xf32>
    %c0_12 = arith.constant 0 : index
    %c0_13 = arith.constant 0 : index
    %12 = vector.load %arg6[%c0_12, %c0_13] : memref<1x32xf32, #tpu.memory_space<vmem>>, vector<1x32xf32>
    %13 = vector.broadcast %12 : vector<1x32xf32> to vector<6x32xf32>
    %14 = arith.addf %7, %13 : vector<6x32xf32>
    %15 = vector.shape_cast %14 : vector<6x32xf32> to vector<2x3x32xf32>
    %16 = vector.broadcast %11 : vector<2x1x32xf32> to vector<2x3x32xf32>
    %17 = arith.mulf %16, %15 : vector<2x3x32xf32>
    %cst_14 = arith.constant dense<0.000000e+00> : vector<2x3xf32>
    %18 = vector.multi_reduction <add>, %17, %cst_14 [2] : vector<2x3x32xf32> to vector<2x3xf32>
    %19 = vector.shape_cast %18 : vector<2x3xf32> to vector<2x3x1xf32>
    %cst_15 = arith.constant dense<0xFF800000> : vector<2x1xf32>
    %20 = vector.multi_reduction <maximumf>, %19, %cst_15 [1] : vector<2x3x1xf32> to vector<2x1xf32>
    %21 = vector.shape_cast %20 : vector<2x1xf32> to vector<2x1x1xf32>
    %22 = tpu.iota {dimensions = array<i32: 1>} : vector<2x3x1xi32>
    %23 = vector.broadcast %21 : vector<2x1x1xf32> to vector<2x3x1xf32>
    %24 = arith.cmpf oeq, %19, %23 : vector<2x3x1xf32>
    %c3_i32 = arith.constant 3 : i32
    %25 = vector.broadcast %c3_i32 : i32 to vector<2x3x1xi32>
    %26 = arith.select %24, %22, %25 : vector<2x3x1xi1>, vector<2x3x1xi32>
    %cst_16 = arith.constant dense<2147483647> : vector<2x1xi32>
    %27 = vector.multi_reduction <minsi>, %26, %cst_16 [1] : vector<2x3x1xi32> to vector<2x1xi32>
    %28 = vector.shape_cast %27 : vector<2x1xi32> to vector<2x1x1xi32>
    %29 = vector.broadcast %28 : vector<2x1x1xi32> to vector<2x3x1xi32>
    %30 = arith.cmpi eq, %22, %29 : vector<2x3x1xi32>
    %cst_17 = arith.constant 0.000000e+00 : f32
    %31 = vector.broadcast %cst_17 : f32 to vector<2x3x256xf32>
    %32 = vector.shape_cast %30 : vector<2x3x1xi1> to vector<2x3x1xi1>
    %33 = vector.broadcast %32 : vector<2x3x1xi1> to vector<2x3x256xi1>
    %34 = arith.select %33, %0, %31 : vector<2x3x256xi1>, vector<2x3x256xf32>
    %cst_18 = arith.constant dense<0.000000e+00> : vector<2x256xf32>
    %35 = vector.multi_reduction <add>, %34, %cst_18 [1] : vector<2x3x256xf32> to vector<2x256xf32>
    %36 = vector.shape_cast %35 : vector<2x256xf32> to vector<2x1x256xf32>
    %c0_19 = arith.constant 0 : index
    %c0_20 = arith.constant 0 : index
    %c0_21 = arith.constant 0 : index
    %37 = vector.load %arg7[%c0_19, %c0_20, %c0_21] : memref<2x1x256xf32, #tpu.memory_space<vmem>>, vector<2x1x256xf32>
    tpu.vector_store %arg7[%c0_19, %c0_20, %c0_21], %36 {strides = array<i32>} : memref<2x1x256xf32, #tpu.memory_space<vmem>>, vector<2x1x256xf32>,
    return
  }
  func.func @transform_0(%arg0: i32) -> (i32, i32, i32) {
    %c0_i32 = arith.constant 0 : i32
    %c0_i32_0 = arith.constant 0 : i32
    %c0_i32_1 = arith.constant 0 : i32
    return %arg0, %c0_i32, %c0_i32_0 : i32, i32, i32
  }
  func.func @transform_1(%arg0: i32) -> (i32, i32, i32) {
    %c0_i32 = arith.constant 0 : i32
    %c0_i32_0 = arith.constant 0 : i32
    %c0_i32_1 = arith.constant 0 : i32
    return %arg0, %c0_i32, %c0_i32_0 : i32, i32, i32
  }
  func.func @transform_2(%arg0: i32) -> (i32, i32) {
    %c0_i32 = arith.constant 0 : i32
    %c0_i32_0 = arith.constant 0 : i32
    %c0_i32_1 = arith.constant 0 : i32
    return %c0_i32, %c0_i32_0 : i32, i32
  }
  func.func @transform_3(%arg0: i32) -> (i32, i32) {
    %c0_i32 = arith.constant 0 : i32
    %c0_i32_0 = arith.constant 0 : i32
    %c0_i32_1 = arith.constant 0 : i32
    return %c0_i32, %c0_i32_0 : i32, i32
  }
  func.func @transform_4(%arg0: i32) -> (i32, i32) {
    %c0_i32 = arith.constant 0 : i32
    %c0_i32_0 = arith.constant 0 : i32
    %c0_i32_1 = arith.constant 0 : i32
    return %c0_i32, %c0_i32_0 : i32, i32
  }
  func.func @transform_5(%arg0: i32) -> (i32, i32) {
    %c0_i32 = arith.constant 0 : i32
    %c0_i32_0 = arith.constant 0 : i32
    %c0_i32_1 = arith.constant 0 : i32
    return %c0_i32, %c0_i32_0 : i32, i32
  }
  func.func @transform_6(%arg0: i32) -> (i32, i32, i32) {
    %c0_i32 = arith.constant 0 : i32
    %c0_i32_0 = arith.constant 0 : i32
    %c0_i32_1 = arith.constant 0 : i32
    return %arg0, %c0_i32, %c0_i32_0 : i32, i32, i32
  }
}

</mosaic_0001>

<bundles_post_ra>
// kernel: self_attention_select.1
= control target key start
LH: loop header
LB: loop body
LE: loop exit
PB: predicated region body
PF: predicated region fallthrough
CT: control target
= control target key end

     0   :  { %v720_v20 = vmov 1966171168   ;;  %v64_v22 = vlaneseq  ;;  %vm510_vm0 = vcmask 256000   ;;  %vm517_vm1 = vcmask 1042432   ;;  %s1039_s4 = inlined_call_operand.vmem [shape: f32[256,32], index: 4, kind: input, shape index: {}]   ;;  %s1040_s2 = inlined_call_operand.vmem [shape: f32[256,32], index: 2, kind: input, shape index: {}]   ;;  %s1041_s1 = inlined_call_operand.vmem [shape: f32[2,3,256], index: 1, kind: input, shape index: {}]   ;;  %s1042_s0 = inlined_call_operand.vmem [shape: f32[2,1,256], index: 0, kind: input, shape index: {}]   ;;  %s1043_s3 = inlined_call_operand.vmem [shape: f32[1,32], index: 3, kind: input, shape index: {}]   ;;  %s1044_s5 = inlined_call_operand.vmem [shape: f32[1,32], index: 5, kind: input, shape index: {}]   ;;  %s1045_s6 = inlined_call_operand.vmem [shape: f32[2,1,256], index: 6, kind: output, shape index: {}]  }
   0x1   :  { %v138_v0 = vld [vmem:[%s1039_s4 + $0xf8] sm:$0xff]  ;;  %v137_v2 = vld [vmem:[%s1039_s4 + $0xf0] sm:$0xff]  ;;  %v136_v4 = vld [vmem:[%s1039_s4 + $0xe8] sm:$0xff]  ;;  %v62_v21 = vunpack.c.l.s4 %v720_v20 }
   0x2   :  { %v122_v1 = vld [vmem:[%s1039_s4 + $0x78] sm:$0xff]  ;;  %683 = vmatprep.subr.mxu1 %v138_v0  ;;  %v121_v3 = vld [vmem:[%s1039_s4 + $0x70] sm:$0xff]  ;;  %v120_v7 = vld [vmem:[%s1039_s4 + $0x68] sm:$0xff]  ;;  %v841_v32 = vshrl.u32 %v64_v22, 7  ;;  %vm638_vm12 = vcmp.lt.s32.totalorder %v64_v22, 256 }
   0x3   :  { %684 = vmatpush3.msra.mxu1 %v122_v1  ;;  %v58_v5 = vld [vmem:[%s1040_s2 + $0xf8] sm:$0xff]  ;;  %v57_v8 = vld [vmem:[%s1040_s2 + $0xf0] sm:$0xff]  ;;  %v135_v9 = vld [vmem:[%s1039_s4 + $0xe0] sm:$0xff]  ;;  %v63_v31 = vunpack.c.0.s8 %v62_v21 }
   0x4   :  { %v42_v6 = vld [vmem:[%s1040_s2 + $0x78] sm:$0xff]  ;;  %685 = vmatprep.subr.mxu1 %v137_v2  ;;  %648 = vmatprep.subr.mxu0 %v58_v5  ;;  %v41_v10 = vld [vmem:[%s1040_s2 + $0x70] sm:$0xff]  ;;  %v56_v11 = vld [vmem:[%s1040_s2 + $0xe8] sm:$0xff] }
   0x5   :  { %686 = vmatpush3.msra.mxu1 %v121_v3  ;;  %649 = vmatpush3.msra.mxu0 %v42_v6  ;;  %v119_v12 = vld [vmem:[%s1039_s4 + $0x60] sm:$0xff]  ;;  %v40_v13 = vld [vmem:[%s1040_s2 + $0x68] sm:$0xff]  ;;  %v134_v14 = vld [vmem:[%s1039_s4 + $0xd8] sm:$0xff]  ;;  %v868_v41 = vsub.s32 %v63_v31, %v841_v32 }
   0x6   :  { %687 = vmatprep.subr.mxu1 %v136_v4  ;;  %650 = vmatprep.subr.mxu0 %v57_v8  ;;  %v55_v15 = vld [vmem:[%s1040_s2 + $0xe0] sm:$0xff]  ;;  %v118_v16 = vld [vmem:[%s1039_s4 + $0x58] sm:$0xff]  ;;  %v133_v18 = vld [vmem:[%s1039_s4 + $0xd0] sm:$0xff] }
   0x7   :  { %688 = vmatpush3.msra.mxu1 %v120_v7  ;;  %651 = vmatpush3.msra.mxu0 %v41_v10  ;;  %v39_v17 = vld [vmem:[%s1040_s2 + $0x60] sm:$0xff]  ;;  %v54_v19 = vld [vmem:[%s1040_s2 + $0xd8] sm:$0xff]  ;;  %v117_v23 = vld [vmem:[%s1039_s4 + $0x50] sm:$0xff] }
   0x8   :  { %689 = vmatprep.subr.mxu1 %v135_v9  ;;  %652 = vmatprep.subr.mxu0 %v56_v11  ;;  %v38_v24 = vld [vmem:[%s1040_s2 + $0x58] sm:$0xff]  ;;  %v132_v25 = vld [vmem:[%s1039_s4 + $0xc8] sm:$0xff]  ;;  %v53_v26 = vld [vmem:[%s1040_s2 + $0xd0] sm:$0xff] }
   0x9   :  { %690 = vmatpush3.msra.mxu1 %v119_v12  ;;  %653 = vmatpush3.msra.mxu0 %v40_v13  ;;  %v116_v27 = vld [vmem:[%s1039_s4 + $0x48] sm:$0xff]  ;;  %v37_v28 = vld [vmem:[%s1040_s2 + $0x50] sm:$0xff]  ;;  %v131_v29 = vld [vmem:[%s1039_s4 + $0xc0] sm:$0xff] }
   0xa   :  { %691 = vmatprep.subr.mxu1 %v134_v14  ;;  %654 = vmatprep.subr.mxu0 %v55_v15  ;;  %v52_v30 = vld [vmem:[%s1040_s2 + $0xc8] sm:$0xff]  ;;  %v115_v33 = vld [vmem:[%s1039_s4 + $0x40] sm:$0xff]  ;;  %v130_v35 = vld [vmem:[%s1039_s4 + $0xb8] sm:$0xff] }
   0xb   :  { %692 = vmatpush3.msra.mxu1 %v118_v16  ;;  %655 = vmatpush3.msra.mxu0 %v39_v17  ;;  %v36_v34 = vld [vmem:[%s1040_s2 + $0x48] sm:$0xff]  ;;  %v51_v36 = vld [vmem:[%s1040_s2 + $0xc0] sm:$0xff]  ;;  %v114_v37 = vld [vmem:[%s1039_s4 + $0x38] sm:$0xff] }
   0xc   :  { %693 = vmatprep.subr.mxu1 %v133_v18  ;;  %656 = vmatprep.subr.mxu0 %v54_v19  ;;  %v35_v38 = vld [vmem:[%s1040_s2 + $0x40] sm:$0xff]  ;;  %v129_v39 = vld [vmem:[%s1039_s4 + $0xb0] sm:$0xff]  ;;  %v50_v40 = vld [vmem:[%s1040_s2 + $0xb8] sm:$0xff] }
   0xd   :  { %694 = vmatpush3.msra.mxu1 %v117_v23  ;;  %657 = vmatpush3.msra.mxu0 %v38_v24  ;;  %v113_v42 = vld [vmem:[%s1039_s4 + $0x30] sm:$0xff]  ;;  %v34_v43 = vld [vmem:[%s1040_s2 + $0x38] sm:$0xff]  ;;  %v128_v44 = vld [vmem:[%s1039_s4 + $0xa8] sm:$0xff] }
   0xe   :  { %695 = vmatprep.subr.mxu1 %v132_v25  ;;  %658 = vmatprep.subr.mxu0 %v53_v26  ;;  %v112_v45 = vld [vmem:[%s1039_s4 + $0x28] sm:$0xff]  ;;  %v49_v46 = vld [vmem:[%s1040_s2 + $0xb0] sm:$0xff]  ;;  %v891_v48 = vld [vmem:[%s1041_s1] sm:$0x77] }
   0xf   :  { %696 = vmatpush3.msra.mxu1 %v116_v27  ;;  %659 = vmatpush3.msra.mxu0 %v37_v28  ;;  %v33_v47 = vld [vmem:[%s1040_s2 + $0x30] sm:$0xff]  ;;  %v896_v49 = vld [vmem:[%s1041_s1 + $0x8] sm:$0x77]  ;;  %v127_v50 = vld [vmem:[%s1039_s4 + $0xa0] sm:$0xff]  ;;  %v67_v52 = vrot.slane %v891_v48, %v868_v41 }
  0x10   :  { %697 = vmatprep.subr.mxu1 %v131_v29  ;;  %660 = vmatprep.subr.mxu0 %v52_v30  ;;  %v48_v51 = vld [vmem:[%s1040_s2 + $0xa8] sm:$0xff]  ;;  %v90_v53 = vrot.slane %v896_v49, %v868_v41  ;;  %v111_v54 = vld [vmem:[%s1039_s4 + $0x20] sm:$0xff]  ;;  %v126_v55 = vld [vmem:[%s1039_s4 + $0x98] sm:$0xff] }
  0x11   :  { %698 = vmatpush3.msra.mxu1 %v115_v33  ;;  %661 = vmatpush3.msra.mxu0 %v36_v34  ;;  %v32_v56 = vld [vmem:[%s1040_s2 + $0x28] sm:$0xff]  ;;  %v47_v57 = vld [vmem:[%s1040_s2 + $0xa0] sm:$0xff]  ;;  %v68_v58 = vcombine.high %v67_v52, %v67_v52  ;;  %v75_v59 = vrot.slane %v67_v52, %v868_v41  ;;  %v110_v63 = vld [vmem:[%s1039_s4 + $0x18] sm:$0xff] }
  0x12   :  { %699 = vmatprep.subr.mxu1 %v130_v35  ;;  %662 = vmatprep.subr.mxu0 %v51_v36  ;;  %v91_v60 = vcombine.high %v90_v53, %v90_v53  ;;  %v25_v61 = vld [vmem:[%s1042_s0] sm:$0x3]  ;;  %v26_v62 = vld [vmem:[%s1042_s0 + $0x2] sm:$0x3]  ;;  %v98_v1 = vrot.slane %v90_v53, %v868_v41  ;;  %v125_v3 = vld [vmem:[%s1039_s4 + $0x90] sm:$0xff] }
  0x13   :  { %700 = vmatpush3.msra.mxu1 %v114_v37  ;;  %663 = vmatpush3.msra.mxu0 %v35_v38  ;;  %v31_v0 = vld [vmem:[%s1040_s2 + $0x20] sm:$0xff]  ;;  %v148_v2 = vcombine.low %v25_v61, %v26_v62  ;;  %v46_v4 = vld [vmem:[%s1040_s2 + $0x98] sm:$0xff]  ;;  %v82_v5 = vrot.slane %v68_v58, %v868_v41  ;;  %v83_v6 = vcombine.high %v75_v59, %v75_v59  ;;  %v109_v8 = vld [vmem:[%s1039_s4 + $0x10] sm:$0xff] }
  0x14   :  { %701 = vmatprep.subr.mxu1 %v129_v39  ;;  %664 = vmatprep.subr.mxu0 %v50_v40  ;;  %v105_v7 = vrot.slane %v91_v60, %v868_v41  ;;  %v30_v9 = vld [vmem:[%s1040_s2 + $0x18] sm:$0xff]  ;;  %v106_v10 = vcombine.high %v98_v1, %v98_v1  ;;  %v124_v12 = vld [vmem:[%s1039_s4 + $0x88] sm:$0xff]  ;;  %v45_v15 = vld [vmem:[%s1040_s2 + $0x90] sm:$0xff] }
  0x15   :  { %702 = vmatpush3.msra.mxu1 %v113_v42  ;;  %665 = vmatpush3.msra.mxu0 %v34_v43  ;;  %v155_v11 = vrot.slane %v148_v2, %v868_v41  ;;  %v273_v13 = vcombine.low %v75_v59, %v82_v5  ;;  %v274_v14 = vcombine.low %v83_v6, %v98_v1  ;;  %v108_v16 = vld [vmem:[%s1039_s4 + $0x8] sm:$0xff]  ;;  %v29_v18 = vld [vmem:[%s1040_s2 + $0x10] sm:$0xff]  ;;  %v123_v20 = vld [vmem:[%s1039_s4 + $0x80] sm:$0xff]  ;;  %v452_v5 = vsub.s32 0, %v841_v32 }
  0x16   :  { %703 = vmatprep.subr.mxu1 %v128_v44  ;;  %666 = vmatprep.subr.mxu0 %v49_v46  ;;  %v275_v17 = vcombine.low %v105_v7, %v106_v10  ;;  %v44_v24 = vld [vmem:[%s1040_s2 + $0x88] sm:$0xff]  ;;  %v107_v25 = vld [vmem:[%s1039_s4] sm:$0xff] }
  0x17   :  { %704 = vmatpush3.msra.mxu1 %v112_v45  ;;  %667 = vmatpush3.msra.mxu0 %v33_v47  ;;  %v156_v19 = vcombine.high %v155_v11, %v155_v11  ;;  %v282_v21 = vrot.slane %v273_v13, %v868_v41  ;;  %v289_v23 = vrot.slane %v274_v14, %v868_v41  ;;  %v28_v27 = vld [vmem:[%s1040_s2 + $0x8] sm:$0xff]  ;;  %v43_v31 = vld [vmem:[%s1040_s2 + $0x80] sm:$0xff] }
  0x18   :  { %705 = vmatprep.subr.mxu1 %v127_v50  ;;  %668 = vmatprep.subr.mxu0 %v48_v51  ;;  %v296_v26 = vrot.slane %v275_v17, %v868_v41  ;;  %v27_v35 = vld [vmem:[%s1040_s2] sm:$0xff]  ;;  %v163_v36 = vrot.slane %v155_v11, %v868_v41 }
  0x19   :  { %706 = vmatpush3.msra.mxu1 %v111_v54  ;;  %669 = vmatpush3.msra.mxu0 %v32_v56  ;;  %v170_v28 = vrot.slane %v156_v19, %v868_v41  ;;  %v298_v29 = vcombine.high %v282_v21, %v289_v23  ;;  %v297_v30 = vcombine.low %v282_v21, %v289_v23  ;;  %v646_v47 = vld [vmem:[%s1043_s3] ss:$0 sm:$0xff] }
  0x1a   :  { %707 = vmatprep.subr.mxu1 %v126_v55  ;;  %670 = vmatprep.subr.mxu0 %v47_v57  ;;  %v299_v33 = vcombine.high %v296_v26, %v296_v26  ;;  %v320_v34 = vrot.slane %v296_v26, %v868_v41  ;;  %v647_v50 = vld [vmem:[%s1044_s5] ss:$0 sm:$0xff] }
  0x1b   :  { %708 = vmatpush3.msra.mxu1 %v110_v63  ;;  %671 = vmatpush3.msra.mxu0 %v31_v0  ;;  %v313_v37 = vrot.slane %v298_v29, %v868_v41  ;;  %v306_v38 = vrot.slane %v297_v30, %v868_v41 }
  0x1c   :  { %709 = vmatprep.subr.mxu1 %v125_v3  ;;  %672 = vmatprep.subr.mxu0 %v46_v4  ;;  %v327_v39 = vrot.slane %v299_v33, %v868_v41 }
  0x1d   :  { %710 = vmatpush3.msra.mxu1 %v109_v8  ;;  %673 = vmatpush3.msra.mxu0 %v30_v9  ;;  %v328_v40 = vcombine.low %v306_v38, %v320_v34 }
  0x1e   :  { %711 = vmatprep.subr.mxu1 %v124_v12  ;;  %674 = vmatprep.subr.mxu0 %v45_v15  ;;  %v329_v42 = vcombine.low %v313_v37, %v327_v39 }
  0x1f   :  { %712 = vmatpush3.msra.mxu1 %v108_v16  ;;  %675 = vmatpush3.msra.mxu0 %v29_v18 }
  0x20   :  { %713 = vmatprep.subr.mxu1 %v123_v20  ;;  %676 = vmatprep.subr.mxu0 %v44_v24 }
  0x21   :  { %714 = vmatpush3.msra.mxu1 %v107_v25  ;;  %677 = vmatpush3.msra.mxu0 %v28_v27 }
  0x22   :  { %678 = vmatprep.subr.mxu0 %v43_v31  ;;  %237 = vmatprep.mubr.f32.mxu0 %v170_v28 }
  0x23   :  { %679 = vmatpush3.msra.mxu0 %v27_v35  ;;  %396 = vmatprep.mubr.f32.mxu1 %v329_v42 }
  0x24   :  { %238 = vmatmul.mubr.f32.vlgmr.msra.gmra.mxu0 %v163_v36  ;;  %397 = vmatmul.mubr.f32.vlgmr.msra.gmra.mxu1 %v328_v40 }
  0xe4   :  { %v680_v43 = vpop.f32.mrf.mxu0  ;;  %v715_v45 = vpop.f32.mrf.mxu1 }
  0xe6   :  { %v681_v44 = vpop.f32.mrf.mxu0  ;;  %v716_v51 = vpop.f32.mrf.mxu1 }
  0xe7   :  { %v682_v46 = vadd.f32 %v681_v44, %v680_v43  ;;  %v717_v52 = vadd.f32 %v716_v51, %v715_v45 }
  0xe9   :  { %v240_v53 = vadd.f32 %v682_v46, %v646_v47  ;;  %v399_v54 = vadd.f32 %v717_v52, %v647_v50 }
  0xeb   :  { %v403_v55 = vcombine.high %v399_v54, %v399_v54  ;;  %v410_v56 = vrot.slane %v399_v54, %v868_v41  ;;  %v250_v57 = vrot.slane %v240_v53, %v868_v41 }
  0xed   :  { %v417_v58 = vrot.slane %v403_v55, %v868_v41  ;;  %v418_v59 = vcombine.high %v410_v56, %v410_v56  ;;  %v426_v60 = vrot.slane %v410_v56, %v868_v41  ;;  %v251_v0 = vcombine.high %v250_v57, %v250_v57 }
  0xee   :  { %v258_v6 = vrot.slane %v250_v57, %v868_v41  ;;  %v564_v56 = vcombine.high %v891_v48, %v891_v48 }
  0xef   :  { %v419_v61 = vcombine.high %v417_v58, %v417_v58  ;;  %v440_v62 = vrot.slane %v418_v59, %v868_v41  ;;  %v448_v63 = vcombine.high %v426_v60, %v426_v60  ;;  %v433_v1 = vrot.slane %v417_v58, %v868_v41 }
  0xf0   :  { %v265_v11 = vrot.slane %v251_v0, %v868_v41  ;;  %v453_v14 = vrot.slane %v258_v6, %v452_v5 }
  0xf1   :  { %v449_v2 = vcombine.high %v440_v62, %v440_v62  ;;  %v460_v3 = vcombine.low %v426_v60, %v440_v62  ;;  %v447_v4 = vrot.slane %v419_v61, %v868_v41  ;;  %v474_v8 = vrot.slane %v448_v63, %v868_v41 }
  0xf2   :  { %v457_v18 = vrot.slane %v265_v11, %v452_v5  ;;  %v565_v62 = vcombine.high %v896_v49, %v896_v49 }
  0xf3   :  { %v467_v7 = vrot.slane %v460_v3, %v868_v41  ;;  %v483_v9 = vcombine.low %v449_v2, %v433_v1  ;;  %v497_v13 = vrot.slane %v447_v4, %v868_v41 }
  0xf5   :  { %v475_v10 = vcombine.low %v467_v7, %v474_v8  ;;  %v490_v12 = vrot.slane %v483_v9, %v868_v41 }
  0xf7   :  { %v482_v15 = vrot.slane %v475_v10, %v868_v41  ;;  %v498_v16 = vcombine.low %v490_v12, %v497_v13 }
  0xf9   :  { %v508_v17 = vmul.f32 %v482_v15, %v453_v14  ;;  %v505_v19 = vrot.slane %v498_v16, %v868_v41 }
  0xfb   :  { %v511_v20 = vsel %vm510_vm0, %v508_v17, 0.0  ;;  %v509_v21 = vmul.f32 %v505_v19, %v457_v18 }
  0xfc   :  { %512 = vadd.xlane.f32.xlu0 %v511_v20 }
  0xfd   :  { %v514_v23 = vsel %vm510_vm0, %v509_v21, 0.0 }
 0x100   :  { %515 = vadd.xlane.f32.xlu0 %v514_v23 }
 0x185   :  { %v513_v24 = vpop.xlane.xlu0 %512 }
 0x186   :  { %v518_v25 = vsel %vm517_vm1, %v513_v24, -inf }
 0x187   :  { %v519_v26 = vrot.slane %v518_v25, 4 }
 0x189   :  { %v520_v27 = vmax.f32 %v518_v25, %v519_v26  ;;  %v516_v28 = vpop.xlane.xlu0 %515 }
 0x18a   :  { %v525_v29 = vsel %vm517_vm1, %v516_v28, -inf }
 0x18b   :  { %v521_v30 = vrot.slane %v520_v27, 2  ;;  %v526_v31 = vrot.slane %v525_v29, 4 }
 0x18d   :  { %v522_v33 = vmax.f32 %v520_v27, %v521_v30  ;;  %v527_v34 = vmax.f32 %v525_v29, %v526_v31 }
 0x18f   :  { %v523_v35 = vrot.slane %v522_v33, 1  ;;  %v528_v36 = vrot.slane %v527_v34, 2 }
 0x191   :  { %v524_v37 = vmax.f32 %v522_v33, %v523_v35  ;;  %v529_v38 = vmax.f32 %v527_v34, %v528_v36 }
 0x193   :  { %vm534_vm2 = vcmp.eq.f32.partialorder %v513_v24, %v524_v37  ;;  %v530_v39 = vrot.slane %v529_v38, 1 }
 0x194   :  { %v536_v40 = vsel %vm534_vm2, %v841_v32, 3 }
 0x195   :  { %v538_v42 = vsel %vm517_vm1, %v536_v40, 2147483647  ;;  %v531_v43 = vmax.f32 %v529_v38, %v530_v39 }
 0x196   :  { %v539_v44 = vrot.slane %v538_v42, 4 }
 0x197   :  { %vm535_vm3 = vcmp.eq.f32.partialorder %v516_v28, %v531_v43 }
 0x198   :  { %vm540_vm4 = vcmp.lt.s32.totalorder %v538_v42, %v539_v44  ;;  %v537_v45 = vsel %vm535_vm3, %v841_v32, 3 }
 0x199   :  { %v541_v46 = vsel %vm540_vm4, %v538_v42, %v539_v44  ;;  %v548_v47 = vsel %vm517_vm1, %v537_v45, 2147483647 }
 0x19a   :  { %v542_v50 = vrot.slane %v541_v46, 2  ;;  %v549_v51 = vrot.slane %v548_v47, 4 }
 0x19c   :  { %vm543_vm5 = vcmp.lt.s32.totalorder %v541_v46, %v542_v50  ;;  %vm550_vm6 = vcmp.lt.s32.totalorder %v548_v47, %v549_v51 }
 0x19d   :  { %v544_v52 = vsel %vm543_vm5, %v541_v46, %v542_v50  ;;  %v551_v53 = vsel %vm550_vm6, %v548_v47, %v549_v51 }
 0x19e   :  { %v545_v54 = vrot.slane %v544_v52, 1  ;;  %v552_v55 = vrot.slane %v551_v53, 2 }
 0x1a0   :  { %vm546_vm7 = vcmp.lt.s32.totalorder %v544_v52, %v545_v54  ;;  %vm553_vm8 = vcmp.lt.s32.totalorder %v551_v53, %v552_v55 }
 0x1a1   :  { %v547_v57 = vsel %vm546_vm7, %v544_v52, %v545_v54  ;;  %v554_v58 = vsel %vm553_vm8, %v551_v53, %v552_v55 }
 0x1a2   :  { %vm558_vm9 = vcmp.eq.s32.totalorder %v841_v32, %v547_v57  ;;  %v555_v59 = vrot.slane %v554_v58, 1 }
 0x1a3   :  { %v568_v60 = vsel %vm558_vm9, %v891_v48, 0.0  ;;  %v569_v61 = vsel %vm558_vm9, %v564_v56, 0.0 }
 0x1a4   :  { %v572_v63 = vsel %vm517_vm1, %v568_v60, 0.0  ;;  %v579_v0 = vsel %vm517_vm1, %v569_v61, 0.0  ;;  %vm556_vm10 = vcmp.lt.s32.totalorder %v554_v58, %v555_v59 }
 0x1a5   :  { %v573_v1 = vrot.slane %v572_v63, 4  ;;  %v580_v2 = vrot.slane %v579_v0, 4  ;;  %v557_v3 = vsel %vm556_vm10, %v554_v58, %v555_v59 }
 0x1a6   :  { %vm559_vm11 = vcmp.eq.s32.totalorder %v841_v32, %v557_v3 }
 0x1a7   :  { %v574_v4 = vadd.f32 %v573_v1, %v572_v63  ;;  %v581_v5 = vadd.f32 %v580_v2, %v579_v0  ;;  %v570_v6 = vsel %vm559_vm11, %v896_v49, 0.0  ;;  %v571_v7 = vsel %vm559_vm11, %v565_v62, 0.0 }
 0x1a8   :  { %v586_v48 = vsel %vm517_vm1, %v570_v6, 0.0  ;;  %v593_v8 = vsel %vm517_vm1, %v571_v7, 0.0 }
 0x1a9   :  { %v575_v9 = vrot.slane %v574_v4, 2  ;;  %v582_v10 = vrot.slane %v581_v5, 2  ;;  %v587_v11 = vrot.slane %v586_v48, 4  ;;  %v594_v12 = vrot.slane %v593_v8, 4 }
 0x1ab   :  { %v576_v13 = vadd.f32 %v575_v9, %v574_v4  ;;  %v583_v14 = vadd.f32 %v582_v10, %v581_v5  ;;  %v588_v15 = vadd.f32 %v587_v11, %v586_v48  ;;  %v595_v16 = vadd.f32 %v594_v12, %v593_v8 }
 0x1ad   :  { %v577_v17 = vrot.slane %v576_v13, 1  ;;  %v584_v18 = vrot.slane %v583_v14, 1  ;;  %v589_v32 = vrot.slane %v588_v15, 2  ;;  %v596_v19 = vrot.slane %v595_v16, 2 }
 0x1af   :  { %v578_v20 = vadd.f32 %v577_v17, %v576_v13  ;;  %v585_v21 = vadd.f32 %v584_v18, %v583_v14  ;;  %v590_v49 = vadd.f32 %v589_v32, %v588_v15  ;;  %v597_v23 = vadd.f32 %v596_v19, %v595_v16 }
 0x1b1   :  { %v604_v24 = vcombine.low %v578_v20, %v585_v21  ;;  %v591_v25 = vrot.slane %v590_v49, 1  ;;  %v598_v26 = vrot.slane %v597_v23, 1 }
 0x1b3   :  { %v611_v27 = vrot.slane %v604_v24, %v868_v41  ;;  %v592_v28 = vadd.f32 %v591_v25, %v590_v49  ;;  %v599_v29 = vadd.f32 %v598_v26, %v597_v23 }
 0x1b5   :  { %v618_v30 = vrot.slane %v611_v27, %v868_v41  ;;  %v619_v31 = vcombine.low %v592_v28, %v599_v29 }
 0x1b7   :  { %640 = vst.msk [vmem:[%s1045_s6] sm:$0x3] %vm638_vm12, %v618_v30  ;;  %v626_v33 = vrot.slane %v619_v31, %v868_v41 }
 0x1b9   :  { %v633_v34 = vrot.slane %v626_v33, %v868_v41 }
 0x1bb   :  { %641 = vst.msk [vmem:[%s1045_s6 + $0x2] sm:$0x3] %vm638_vm12, %v633_v34 }

</bundles_post_ra>
